<compile_context>
chip_gen: v5e
topology: v5e:2x2
jax: 0.10.0
libtpu: 0.0.40
codegen_flags: <defaults>
</compile_context>

<pallas_src>
import jax
import jax.numpy as jnp
from jax.experimental import pallas as pl
from jax.experimental.pallas import tpu as pltpu


def _round_up(a, b):
    return ((a + b - 1) // b) * b


# ----------------------------- Pallas kernel ------------------------------- #

def _fused_adapter_kernel(x_ref, wd_ref, bd_ref, ws_ref, bs_ref,
                          wu_ref, bu_ref, o_ref):
    w_dtype = wd_ref.dtype
    # down: Linear(d_model -> mid) + ReLU   (f32 accumulation on the MXU)
    h = jnp.dot(x_ref[...], wd_ref[...],
                preferred_element_type=jnp.float32) + bd_ref[...]
    h = jnp.maximum(h, 0.0).astype(w_dtype)
    # shared adapter: Linear(mid -> mid) + ReLU (the mid_dim == d_model form).
    # mid=32 is lane-sparse / MXU-underfilled, but it never touches HBM and the
    # kernel is bandwidth-bound, so we deliberately do NOT pad mid to 128.
    h = jnp.dot(h, ws_ref[...],
                preferred_element_type=jnp.float32) + bs_ref[...]
    h = jnp.maximum(h, 0.0).astype(w_dtype)
    # up: Linear(mid -> d_model). adapter_scale is pre-folded into wu/bu on the
    # host, so the epilogue is just a cast + lane-dense store.
    out = jnp.dot(h, wu_ref[...],
                  preferred_element_type=jnp.float32) + bu_ref[...]
    o_ref[...] = out.astype(o_ref.dtype)


def apply_adapter_pallas(x, adapter, shared, scale, *, tm=512,
                         compute_dtype=None):
    """Fused adapter application on TPU.

    x: (N, d_model) token rows.  tm: row tile (sweep 256-1024; multiples of
    256 fill the v6e/v7x MXU).  compute_dtype: optionally stream x / out /
    weights in bf16 to halve HBM bytes (accumulation stays f32).
    """
    wd, bd = adapter["down_w"], adapter["down_b"]
    wu, bu = adapter["up_w"], adapter["up_b"]
    ws, bs = shared["down_w"], shared["down_b"]

    # Fold the constant adapter_scale into the up projection once (host side).
    scale = float(scale)
    wu = (wu.astype(jnp.float32) * scale).astype(wu.dtype)
    bu = (bu.astype(jnp.float32) * scale).astype(bu.dtype)

    if compute_dtype is not None:
        x = x.astype(compute_dtype)
        wd, bd = wd.astype(compute_dtype), bd.astype(compute_dtype)
        ws, bs = ws.astype(compute_dtype), bs.astype(compute_dtype)
        wu, bu = wu.astype(compute_dtype), bu.astype(compute_dtype)

    N, D = x.shape

    # Row tile: large to amortize the ~0.35us per-grid-step overhead and fill
    # the MXU, but capped to the sublane-aligned problem size so tiny calls do
    # not over-pad.  N is padded up to a multiple of the tile (padded rows are
    # computed and discarded; they never affect real outputs).
    tm_eff = max(8, min(int(tm), _round_up(N, 8)))
    n_pad = _round_up(N, tm_eff)
    if n_pad != N:
        x = jnp.pad(x, ((0, n_pad - N), (0, 0)))

    def full_spec(arr):
        nd = arr.ndim
        return pl.BlockSpec(arr.shape, lambda i, _nd=nd: (0,) * _nd)

    out = pl.pallas_call(
        _fused_adapter_kernel,
        out_shape=jax.ShapeDtypeStruct((n_pad, D), x.dtype),
        grid_spec=pltpu.PrefetchScalarGridSpec(
            num_scalar_prefetch=0,
            grid=(n_pad // tm_eff,),
            in_specs=[
                pl.BlockSpec((tm_eff, D), lambda i: (i, 0)),   # x rows tile
                full_spec(wd), full_spec(bd),                  # down (resident)
                full_spec(ws), full_spec(bs),                  # shared (resident)
                full_spec(wu), full_spec(bu),                  # up (resident)
            ],
            out_specs=pl.BlockSpec((tm_eff, D), lambda i: (i, 0)),
        ),
        compiler_params=pltpu.CompilerParams(
            dimension_semantics=("parallel",)),
    )(x, wd, bd, ws, bs, wu, bu)

    return out[:N] if n_pad != N else out


# --------------------------- parameter building ---------------------------- #

def _kaiming_normal_fan_out(key, in_dim, out_dim, dtype):
    # PyTorch: kaiming_normal_(weight, mode='fan_out', nonlinearity='relu')
    # Linear weight (out, in) -> fan_out = out_dim; std = sqrt(2 / fan_out).
    std = (2.0 / out_dim) ** 0.5
    w = std * jax.random.normal(key, (in_dim, out_dim), dtype=jnp.float32)
    return w.astype(dtype)


def _build_adapter(key, d_model, n_layers, l_start, l_end, mid_dim, dtype):
    """Mirror of AdapterLearner._build_adapter; returns list of param dicts."""
    adapter = [None] * (n_layers + 1)
    for i in range(l_start, l_end + 1):
        key, k1, k2 = jax.random.split(key, 3)
        if mid_dim == d_model:
            # Sequential(Linear(d, mid), ReLU())
            adapter[i] = {
                "down_w": _kaiming_normal_fan_out(k1, d_model, mid_dim, dtype),
                "down_b": jnp.zeros((1, mid_dim), dtype),
            }
        else:
            # down: Linear(d, mid)+ReLU ; up: Linear(mid, d)
            adapter[i] = {
                "down_w": _kaiming_normal_fan_out(k1, d_model, mid_dim, dtype),
                "down_b": jnp.zeros((1, mid_dim), dtype),
                "up_w": _kaiming_normal_fan_out(k2, mid_dim, d_model, dtype),
                "up_b": jnp.zeros((1, d_model), dtype),
            }
    return adapter


class AdapterLearner:
    """JAX mirror of the PyTorch AdapterLearner (synthetic deterministic init)."""

    def __init__(self, key, n_cls, d_text, d_visual, n_layers,
                 l_start, l_end, mid_dim, adapter_scale, dtype=jnp.float32):
        self.n_cls = n_cls
        kt, kv, ks = jax.random.split(key, 3)
        self.text_adapter = _build_adapter(
            kt, d_text, n_layers, l_start, l_end, mid_dim, dtype)
        self.visual_adapter = _build_adapter(
            kv, d_visual, n_layers, l_start, l_end, mid_dim, dtype)
        # shared adapter: d_model == mid_dim -> Linear+ReLU only
        self.shared_adapter = _build_adapter(
            ks, mid_dim, n_layers, l_start, l_end, mid_dim, dtype)
        self.adapter_scale = float(adapter_scale)
        self.text_adapter_func = lambda x: self.return_text_adapter(index=x)
        self.visual_adapter_func = lambda x: self.return_visual_adapter(index=x)

    def return_text_adapter(self, index):
        if index < len(self.text_adapter) and self.text_adapter[index] is not None:
            return (self.text_adapter[index], self.shared_adapter[index],
                    self.adapter_scale)
        return (None, None, self.adapter_scale)

    def return_visual_adapter(self, index):
        if index < len(self.visual_adapter) and self.visual_adapter[index] is not None:
            return (self.visual_adapter[index], self.shared_adapter[index],
                    self.adapter_scale)
        return (None, None, self.adapter_scale)

    def forward(self):
        # exact forward() semantics of the PyTorch module
        return (None, self.text_adapter_func, self.visual_adapter_func)


# ------------------------------- reference --------------------------------- #

def _ref_apply(x, adapter, shared, scale):
    h = jnp.maximum(x @ adapter["down_w"] + adapter["down_b"], 0.0)
    h = jnp.maximum(h @ shared["down_w"] + shared["down_b"], 0.0)
    out = h @ adapter["up_w"] + adapter["up_b"]
    return scale * out


# ---------------------------------- main ------------------------------------ #

if __name__ == "__main__":
    key = jax.random.PRNGKey(0)
    k_params, k_x, k_big = jax.random.split(key, 3)

    # small synthetic config (mirrors cfg.TRAINER.TCP_MOD_MMA.*)
    D_TEXT = 128       # clip_model.ln_final.weight.shape[0]
    D_VISUAL = 128     # clip_model.visual.ln_post.weight.shape[0]
    N_LAYERS = 4       # len(transformer.resblocks)
    L_START, L_END = 1, 3
    MID_DIM = 32       # ADAPTER_DIM
    SCALE = 0.5        # ADAPTER_SCALE
    N_CLS = 4

    learner = AdapterLearner(k_params, N_CLS, D_TEXT, D_VISUAL, N_LAYERS,
                             L_START, L_END, MID_DIM, SCALE)

    # forward() returns (None, text_adapter_func, visual_adapter_func)
    none_out, text_fn, visual_fn = learner.forward()
    assert none_out is None
    # out-of-range / un-adapted layer behaves like the PyTorch module
    assert text_fn(0) == (None, None, SCALE)

    # apply the layer-2 visual adapter with the fused Pallas kernel
    adapter, shared, scale = visual_fn(2)

    SEQ, BATCH = 8, 2                       # tokens x batch -> N = 16 rows
    x = jax.random.normal(k_x, (SEQ * BATCH, D_VISUAL), dtype=jnp.float32)

    out = jax.block_until_ready(apply_adapter_pallas(x, adapter, shared, scale))
    ref = _ref_apply(x, adapter, shared, scale)
    assert out.shape == (SEQ * BATCH, D_VISUAL)
    assert jnp.allclose(out, ref, atol=1e-4, rtol=1e-4), "mismatch vs reference"

    # also exercise a text adapter layer
    t_adapter, t_shared, t_scale = text_fn(1)
    t_out = jax.block_until_ready(
        apply_adapter_pallas(x[:, :D_TEXT], t_adapter, t_shared, t_scale))
    assert jnp.allclose(
        t_out, _ref_apply(x[:, :D_TEXT], t_adapter, t_shared, t_scale),
        atol=1e-4, rtol=1e-4)

    # larger, non-divisible token count: exercises the big (tm=512) tile path,
    # the zero-padded last tile, and bf16 streaming (the mem-bound-regime win).
    x_big = jax.random.normal(k_big, (77 * 13, D_VISUAL), dtype=jnp.float32)
    out_big = jax.block_until_ready(
        apply_adapter_pallas(x_big, adapter, shared, scale, tm=512,
                             compute_dtype=jnp.bfloat16))
    ref_big = _ref_apply(x_big, adapter, shared, scale)
    assert out_big.shape == x_big.shape
    assert jnp.allclose(out_big.astype(jnp.float32), ref_big,
                        atol=0.2, rtol=0.05), "bf16 path mismatch vs reference"

    # TODO(synk): the mid_dim == d_model adapter variant (Linear+ReLU only, no
    # 'up' projection) is built by _build_adapter but only the bottleneck form
    # is wired through the fused kernel here (the shared Linear+ReLU form is
    # fused inside it already).
    print("KERNEL_OK")
</pallas_src>

<mosaic_0001>
module attributes {stable_mosaic.version = 11 : i64} {
  func.func @_fused_adapter_kernel(%arg0: i32, %arg1: memref<16x128xf32, #tpu.memory_space<vmem>>, %arg2: memref<128x32xf32, #tpu.memory_space<vmem>>, %arg3: memref<1x32xf32, #tpu.memory_space<vmem>>, %arg4: memref<32x32xf32, #tpu.memory_space<vmem>>, %arg5: memref<1x32xf32, #tpu.memory_space<vmem>>, %arg6: memref<32x128xf32, #tpu.memory_space<vmem>>, %arg7: memref<1x128xf32, #tpu.memory_space<vmem>>, %arg8: memref<16x128xf32, #tpu.memory_space<vmem>>) attributes {dimension_semantics = [#tpu.dimension_semantics<parallel>], iteration_bounds = array<i64: 1>, scalar_prefetch = 0 : i64, scratch_operands = 0 : i64, tpu.core_type = #tpu.core_type<tc>, window_params = [{transform_indices = @transform_0, window_bounds = array<i64: 16, 128>}, {pipeline_mode = #tpu.pipeline_mode<synchronous>, transform_indices = @transform_1, window_bounds = array<i64: 128, 32>}, {pipeline_mode = #tpu.pipeline_mode<synchronous>, transform_indices = @transform_2, window_bounds = array<i64: 1, 32>}, {pipeline_mode = #tpu.pipeline_mode<synchronous>, transform_indices = @transform_3, window_bounds = array<i64: 32, 32>}, {pipeline_mode = #tpu.pipeline_mode<synchronous>, transform_indices = @transform_4, window_bounds = array<i64: 1, 32>}, {pipeline_mode = #tpu.pipeline_mode<synchronous>, transform_indices = @transform_5, window_bounds = array<i64: 32, 128>}, {pipeline_mode = #tpu.pipeline_mode<synchronous>, transform_indices = @transform_6, window_bounds = array<i64: 1, 128>}, {transform_indices = @transform_7, window_bounds = array<i64: 16, 128>}]} {
    %c0 = arith.constant 0 : index
    %c0_0 = arith.constant 0 : index
    %0 = vector.load %arg1[%c0, %c0_0] : memref<16x128xf32, #tpu.memory_space<vmem>>, vector<16x128xf32>
    %c0_1 = arith.constant 0 : index
    %c0_2 = arith.constant 0 : index
    %1 = vector.load %arg2[%c0_1, %c0_2] : memref<128x32xf32, #tpu.memory_space<vmem>>, vector<128x32xf32>
    %cst = arith.constant dense<0.000000e+00> : vector<16x32xf32>
    %2 = tpu.matmul %0, %1, %cst {dimension_numbers = #tpu.dot_dimension_numbers<[1], [0], [0], [1], [0, 0, 1, 1], [], []>} : vector<16x128xf32>, vector<128x32xf32>, vector<16x32xf32> -> vector<16x32xf32>
    %c0_3 = arith.constant 0 : index
    %c0_4 = arith.constant 0 : index
    %3 = vector.load %arg3[%c0_3, %c0_4] : memref<1x32xf32, #tpu.memory_space<vmem>>, vector<1x32xf32>
    %4 = vector.broadcast %3 : vector<1x32xf32> to vector<16x32xf32>
    %5 = arith.addf %2, %4 : vector<16x32xf32>
    %cst_5 = arith.constant 0.000000e+00 : f32
    %6 = vector.broadcast %cst_5 : f32 to vector<16x32xf32>
    %7 = arith.maximumf %5, %6 : vector<16x32xf32>
    %c0_6 = arith.constant 0 : index
    %c0_7 = arith.constant 0 : index
    %8 = vector.load %arg4[%c0_6, %c0_7] : memref<32x32xf32, #tpu.memory_space<vmem>>, vector<32x32xf32>
    %cst_8 = arith.constant dense<0.000000e+00> : vector<16x32xf32>
    %9 = tpu.matmul %7, %8, %cst_8 {dimension_numbers = #tpu.dot_dimension_numbers<[1], [0], [0], [1], [0, 0, 1, 1], [], []>} : vector<16x32xf32>, vector<32x32xf32>, vector<16x32xf32> -> vector<16x32xf32>
    %c0_9 = arith.constant 0 : index
    %c0_10 = arith.constant 0 : index
    %10 = vector.load %arg5[%c0_9, %c0_10] : memref<1x32xf32, #tpu.memory_space<vmem>>, vector<1x32xf32>
    %11 = vector.broadcast %10 : vector<1x32xf32> to vector<16x32xf32>
    %12 = arith.addf %9, %11 : vector<16x32xf32>
    %cst_11 = arith.constant 0.000000e+00 : f32
    %13 = vector.broadcast %cst_11 : f32 to vector<16x32xf32>
    %14 = arith.maximumf %12, %13 : vector<16x32xf32>
    %c0_12 = arith.constant 0 : index
    %c0_13 = arith.constant 0 : index
    %15 = vector.load %arg6[%c0_12, %c0_13] : memref<32x128xf32, #tpu.memory_space<vmem>>, vector<32x128xf32>
    %cst_14 = arith.constant dense<0.000000e+00> : vector<16x128xf32>
    %16 = tpu.matmul %14, %15, %cst_14 {dimension_numbers = #tpu.dot_dimension_numbers<[1], [0], [0], [1], [0, 0, 1, 1], [], []>} : vector<16x32xf32>, vector<32x128xf32>, vector<16x128xf32> -> vector<16x128xf32>
    %c0_15 = arith.constant 0 : index
    %c0_16 = arith.constant 0 : index
    %17 = vector.load %arg7[%c0_15, %c0_16] : memref<1x128xf32, #tpu.memory_space<vmem>>, vector<1x128xf32>
    %18 = vector.broadcast %17 : vector<1x128xf32> to vector<16x128xf32>
    %19 = arith.addf %16, %18 : vector<16x128xf32>
    %c0_17 = arith.constant 0 : index
    %c0_18 = arith.constant 0 : index
    %20 = vector.load %arg8[%c0_17, %c0_18] : memref<16x128xf32, #tpu.memory_space<vmem>>, vector<16x128xf32>
    tpu.vector_store %arg8[%c0_17, %c0_18], %19 {strides = array<i32>} : memref<16x128xf32, #tpu.memory_space<vmem>>, vector<16x128xf32>,
    return
  }
  func.func @transform_0(%arg0: i32) -> (i32, i32) {
    %c0_i32 = arith.constant 0 : i32
    %c0_i32_0 = arith.constant 0 : i32
    return %arg0, %c0_i32 : i32, i32
  }
  func.func @transform_1(%arg0: i32) -> (i32, i32) {
    %c0_i32 = arith.constant 0 : i32
    %c0_i32_0 = arith.constant 0 : i32
    %c0_i32_1 = arith.constant 0 : i32
    return %c0_i32, %c0_i32_0 : i32, i32
  }
  func.func @transform_2(%arg0: i32) -> (i32, i32) {
    %c0_i32 = arith.constant 0 : i32
    %c0_i32_0 = arith.constant 0 : i32
    %c0_i32_1 = arith.constant 0 : i32
    return %c0_i32, %c0_i32_0 : i32, i32
  }
  func.func @transform_3(%arg0: i32) -> (i32, i32) {
    %c0_i32 = arith.constant 0 : i32
    %c0_i32_0 = arith.constant 0 : i32
    %c0_i32_1 = arith.constant 0 : i32
    return %c0_i32, %c0_i32_0 : i32, i32
  }
  func.func @transform_4(%arg0: i32) -> (i32, i32) {
    %c0_i32 = arith.constant 0 : i32
    %c0_i32_0 = arith.constant 0 : i32
    %c0_i32_1 = arith.constant 0 : i32
    return %c0_i32, %c0_i32_0 : i32, i32
  }
  func.func @transform_5(%arg0: i32) -> (i32, i32) {
    %c0_i32 = arith.constant 0 : i32
    %c0_i32_0 = arith.constant 0 : i32
    %c0_i32_1 = arith.constant 0 : i32
    return %c0_i32, %c0_i32_0 : i32, i32
  }
  func.func @transform_6(%arg0: i32) -> (i32, i32) {
    %c0_i32 = arith.constant 0 : i32
    %c0_i32_0 = arith.constant 0 : i32
    %c0_i32_1 = arith.constant 0 : i32
    return %c0_i32, %c0_i32_0 : i32, i32
  }
  func.func @transform_7(%arg0: i32) -> (i32, i32) {
    %c0_i32 = arith.constant 0 : i32
    %c0_i32_0 = arith.constant 0 : i32
    return %arg0, %c0_i32 : i32, i32
  }
}

</mosaic_0001>

<bundles_post_ra>
// kernel: tpu_custom_call.1
= control target key start
LH: loop header
LB: loop body
LE: loop exit
PB: predicated region body
PF: predicated region fallthrough
CT: control target
= control target key end

     0   :  { %s360_s0 = inlined_call_operand.vmem [shape: f32[16,128], index: 0, kind: input, shape index: {}]   ;;  %s361_s1 = inlined_call_operand.vmem [shape: f32[128,32], index: 1, kind: input, shape index: {}]   ;;  %s362_s2 = inlined_call_operand.vmem [shape: f32[1,32], index: 2, kind: input, shape index: {}]   ;;  %s363_s3 = inlined_call_operand.vmem [shape: f32[32,32], index: 3, kind: input, shape index: {}]   ;;  %s364_s4 = inlined_call_operand.vmem [shape: f32[1,32], index: 4, kind: input, shape index: {}]   ;;  %s365_s5 = inlined_call_operand.vmem [shape: f32[32,128], index: 5, kind: input, shape index: {}]   ;;  %s366_s6 = inlined_call_operand.vmem [shape: f32[1,128], index: 6, kind: input, shape index: {}]   ;;  %s367_s7 = inlined_call_operand.hbm [shape: f32[16,128], index: 7, kind: output, shape index: {}]  }
   0x1   :  { %v44_v0 = vld [vmem:[%s361_s1 + $0x78] sm:$0xff]  ;;  %v43_v1 = vld [vmem:[%s361_s1 + $0x70] sm:$0xff]  ;;  %v42_v2 = vld [vmem:[%s361_s1 + $0x68] sm:$0xff] }
   0x2   :  { %49 = vmatpush.msra.mxu0 %v44_v0  ;;  %175 = vmatpush.msra.mxu3 %v44_v0  ;;  %v41_v3 = vld [vmem:[%s361_s1 + $0x60] sm:$0xff]  ;;  %v40_v4 = vld [vmem:[%s361_s1 + $0x58] sm:$0xff] }
   0x3   :  { %v77_v5 = vld [vmem:[%s363_s3 + $0x18] sm:$0xff] }
   0x4   :  { %50 = vmatpush.msra.mxu0 %v43_v1  ;;  %176 = vmatpush.msra.mxu3 %v43_v1 }
   0x6   :  { %51 = vmatpush.msra.mxu0 %v42_v2  ;;  %177 = vmatpush.msra.mxu3 %v42_v2 }
   0x8   :  { %52 = vmatpush.msra.mxu0 %v41_v3  ;;  %178 = vmatpush.msra.mxu3 %v41_v3 }
   0x9   :  { %12 = vsyncpa [#allocation3], 0  ;;  %v39_v6 = vld [vmem:[%s361_s1 + $0x50] sm:$0xff]  ;;  %101 = vmatpush.msra.mxu1 %v77_v5  ;;  %v38_v7 = vld [vmem:[%s361_s1 + $0x48] sm:$0xff]  ;;  %vm82_vm0 = vcmask 261120   ;;  %s159_s11 = sshll.u32 %s367_s7, 4  ;;  %s160_s11 = int_to_ptr.hbm [resolvable:$true] %s159_s11 }
   0xa   :  { %53 = vmatpush.msra.mxu0 %v40_v4  ;;  %179 = vmatpush.msra.mxu3 %v40_v4  ;;  %v37_v8 = vld [vmem:[%s361_s1 + $0x40] sm:$0xff]  ;;  %v36_v9 = vld [vmem:[%s361_s1 + $0x38] sm:$0xff]  ;;  %v35_v10 = vld [vmem:[%s361_s1 + $0x30] sm:$0xff]  ;;  %s224_s12 = smov 128   ;;  %s225_s13 = smov 8  }
   0xb   :  { %v34_v11 = vld [vmem:[%s361_s1 + $0x28] sm:$0xff]  ;;  %v33_v12 = vld [vmem:[%s361_s1 + $0x20] sm:$0xff]  ;;  %v32_v13 = vld [vmem:[%s361_s1 + $0x18] sm:$0xff] }
   0xc   :  { %54 = vmatpush.msra.mxu0 %v39_v6  ;;  %180 = vmatpush.msra.mxu3 %v39_v6  ;;  %v31_v14 = vld [vmem:[%s361_s1 + $0x10] sm:$0xff]  ;;  %v30_v15 = vld [vmem:[%s361_s1 + $0x8] sm:$0xff]  ;;  %v29_v16 = vld [vmem:[%s361_s1] sm:$0xff] }
   0xd   :  { %v27_v17 = vld [vmem:[%s360_s0] sm:$0xff]  ;;  %v28_v18 = vld [vmem:[%s360_s0 + $0x8] sm:$0xff]  ;;  %v76_v19 = vld [vmem:[%s363_s3 + $0x10] sm:$0xff] }
   0xe   :  { %55 = vmatpush.msra.mxu0 %v38_v7  ;;  %181 = vmatpush.msra.mxu3 %v38_v7  ;;  %v75_v20 = vld [vmem:[%s363_s3 + $0x8] sm:$0xff]  ;;  %v74_v21 = vld [vmem:[%s363_s3] sm:$0xff]  ;;  %v117_v22 = vld [vmem:[%s365_s5 + $0x18] sm:$0xff] }
   0xf   :  { %102 = vmatpush.msra.mxu1 %v76_v19  ;;  %140 = vmatpush.msra.mxu2 %v117_v22  ;;  %v194_v23 = vld [vmem:[%s362_s2] ss:$0 sm:$0xff]  ;;  %v116_v30 = vld [vmem:[%s365_s5 + $0x10] sm:$0xff]  ;;  %v115_v31 = vld [vmem:[%s365_s5 + $0x8] sm:$0xff] }
  0x10   :  { %56 = vmatpush.msra.mxu0 %v37_v8  ;;  %182 = vmatpush.msra.mxu3 %v37_v8  ;;  %v114_v32 = vld [vmem:[%s365_s5] sm:$0xff]  ;;  %s223_s5 = smov [#allocation2]  }
  0x11   :  { %103 = vmatpush.msra.mxu1 %v75_v20  ;;  %141 = vmatpush.msra.mxu2 %v116_v30  ;;  %v195_v33 = vld [vmem:[%s364_s4] ss:$0 sm:$0xff]  ;;  %s157_s9 = sshll.u32 %s223_s5, 4  ;;  %s158_s9 = int_to_ptr.vmem [resolvable:$true] %s157_s9 }
  0x12   :  { %57 = vmatpush.msra.mxu0 %v36_v9  ;;  %183 = vmatpush.msra.mxu3 %v36_v9  ;;  %v196_v40 = vld [vmem:[%s366_s6] ss:$0 sm:$0xff] }
  0x13   :  { %104 = vmatpush.msra.mxu1 %v74_v21  ;;  %142 = vmatpush.msra.mxu2 %v115_v31 }
  0x14   :  { %58 = vmatpush.msra.mxu0 %v35_v10  ;;  %184 = vmatpush.msra.mxu3 %v35_v10 }
  0x15   :  { %143 = vmatpush.msra.mxu2 %v114_v32 }
  0x16   :  { %59 = vmatpush.msra.mxu0 %v34_v11  ;;  %185 = vmatpush.msra.mxu3 %v34_v11 }
  0x18   :  { %60 = vmatpush.msra.mxu0 %v33_v12  ;;  %186 = vmatpush.msra.mxu3 %v33_v12 }
  0x1a   :  { %61 = vmatpush.msra.mxu0 %v32_v13  ;;  %187 = vmatpush.msra.mxu3 %v32_v13 }
  0x1c   :  { %62 = vmatpush.msra.mxu0 %v31_v14  ;;  %188 = vmatpush.msra.mxu3 %v31_v14 }
  0x1e   :  { %63 = vmatpush.msra.mxu0 %v30_v15  ;;  %189 = vmatpush.msra.mxu3 %v30_v15 }
  0x20   :  { %64 = vmatpush.msra.mxu0 %v29_v16  ;;  %190 = vmatpush.msra.mxu3 %v29_v16 }
  0x21   :  { %65 = vmatmul.f32.vlgmr.msra.gmra.mxu0 %v27_v17  ;;  %68 = vmatmul.f32.vlgmr.msra.gmra.mxu3 %v28_v18 }
  0x9e   :  { %v66_v24 = vpop.f32.mrf.mxu0 }
  0x9f   :  { %v67_v25 = vadd.f32 %v194_v23, %v66_v24 }
  0xa1   :  { %v72_v26 = vmax.f32 %v67_v25, 0.0 }
  0xa3   :  { %171 = vmatmul.msk.f32.vlgmr.msra.gmra.mxu1 %vm82_vm0, %v72_v26 }
  0xa4   :  { %v69_v27 = vpop.f32.mrf.mxu3 }
  0xa5   :  { %v70_v28 = vadd.f32 %v194_v23, %v69_v27 }
  0xa7   :  { %v73_v29 = vmax.f32 %v70_v28, 0.0 }
  0xab   :  { %172 = vmatmul.msk.f32.gmra.mxu1 %vm82_vm0, %v73_v29 }
 0x120   :  { %v106_v34 = vpop.f32.mrf.mxu1 }
 0x121   :  { %v107_v35 = vadd.f32 %v195_v33, %v106_v34 }
 0x123   :  { %v112_v36 = vmax.f32 %v107_v35, 0.0 }
 0x125   :  { %173 = vmatmul.msk.f32.vlgmr.msra.gmra.mxu2 %vm82_vm0, %v112_v36 }
 0x128   :  { %v109_v37 = vpop.f32.mrf.mxu1 }
 0x129   :  { %v110_v38 = vadd.f32 %v195_v33, %v109_v37 }
 0x12b   :  { %v113_v39 = vmax.f32 %v110_v38, 0.0 }
 0x12d   :  { %174 = vmatmul.msk.f32.gmra.mxu2 %vm82_vm0, %v113_v39 }
 0x1a8   :  { %v145_v41 = vpop.f32.mrf.mxu2 }
 0x1a9   :  { %v146_v42 = vadd.f32 %v196_v40, %v145_v41 }
 0x1ab   :  { %151 = vst [vmem:[#allocation2] sm:$0xff] %v146_v42 }
 0x1b0   :  { %v148_v43 = vpop.f32.mrf.mxu2 }
 0x1b1   :  { %v149_v44 = vadd.f32 %v196_v40, %v148_v43 }
 0x1b3   :  { %152 = vst [vmem:[#allocation2 + $0x8] sm:$0xff] %v149_v44 }
 0x1b4   :  { %165 = dma.vmem_to_hbm [thread:$0]  %s158_s9, 256, %s160_s11, [#allocation3], %s224_s12, %s224_s12, %s225_s13  }
 0x1b5   :  { %221 = dma.done.wait [#allocation3], 256  }
 0x1b6   :  { %222 = vsyncadd [#allocation3], 4294967040 }
 0x1b7   :  { %170 = vsyncpa [#allocation3], 1 }

</bundles_post_ra>
